<compile_context>
chip_gen: v5e
topology: v5e:2x2
jax: 0.10.0
libtpu: 0.0.40
codegen_flags: <defaults>
</compile_context>

<pallas_src>
import jax
import jax.numpy as jnp
from jax.experimental import pallas as pl
from jax.experimental.pallas import tpu as pltpu


def _round_up(n, m):
    return ((n + m - 1) // m) * m


def cuisine_mlp_kernel(x_ref, w1_ref, b1_ref, w2_ref, b2_ref, w3_ref, b3_ref,
                       o_ref):
    # x tile arrives as f32 (unpadded); cast to bf16 for the MXU, accumulate
    # in f32, keep all VPU/EUP math (bias add, ReLU, softmax) in f32.
    x = x_ref[...].astype(jnp.bfloat16)

    h1 = jnp.dot(x, w1_ref[...], preferred_element_type=jnp.float32) + b1_ref[...]
    h1 = jnp.maximum(h1, 0.0)                                   # ReLU (VPU)

    h2 = jnp.dot(h1.astype(jnp.bfloat16), w2_ref[...],
                 preferred_element_type=jnp.float32) + b2_ref[...]
    h2 = jnp.maximum(h2, 0.0)                                   # ReLU (VPU)

    logits = jnp.dot(h2.astype(jnp.bfloat16), w3_ref[...],
                     preferred_element_type=jnp.float32) + b3_ref[...]

    # Numerically-stable softmax over the class axis (dim=1).
    # Exact divide (not pl.reciprocal(approx=True)) so rows sum to 1 within
    # f32 rounding; this kernel has massive compute slack, so it is free.
    m = jnp.max(logits, axis=-1, keepdims=True)
    e = jnp.exp(logits - m)
    denom = jnp.sum(e, axis=-1, keepdims=True)
    o_ref[...] = (e / denom).astype(o_ref.dtype)


def prepare_params(params):
    """Cast weights to bf16 once (MXU inputs); biases stay f32. No padding."""
    in_size, l1 = params["w1"].shape
    l2 = params["w2"].shape[1]
    out_size = params["w3"].shape[1]
    return {
        "w1": params["w1"].astype(jnp.bfloat16),
        "b1": params["b1"].astype(jnp.float32),
        "w2": params["w2"].astype(jnp.bfloat16),
        "b2": params["b2"].astype(jnp.float32),
        "w3": params["w3"].astype(jnp.bfloat16),
        "b3": params["b3"].astype(jnp.float32),
        "dims": (in_size, l1, l2, out_size),
    }


def cuisine_nn_forward(x, prepped, tb_max=1024):
    """x: (B, in_size) float32. prepped: output of prepare_params."""
    in_size, l1, l2, out_size = prepped["dims"]
    B = x.shape[0]

    # Tile selection:
    #  - at most tb_max rows per step (mem-bound kernels need big tiles, but
    #    this still leaves huge scoped-VMEM headroom on v5e/v6e/v7x),
    #  - >= 2 steps for non-trivial batches so the "parallel" grid axis can
    #    shard across both v7x TensorCores,
    #  - tile rounded to a sublane multiple of 8, grid divides the (minimally
    #    padded) batch so no up-to-2x padding waste.
    min_steps = 2 if B > 8 else 1
    n_steps = max(min_steps, pl.cdiv(B, tb_max))
    tb = _round_up(pl.cdiv(B, n_steps), 8)
    n_steps = pl.cdiv(B, tb)
    b_p = tb * n_steps

    # Minimal row-only padding (no column pad, no dtype cast in the wrapper).
    x_in = x if b_p == B else jnp.pad(x, ((0, b_p - B), (0, 0)))

    # Weights/biases stay VMEM-resident across all grid steps.
    resident = lambda a: pl.BlockSpec(a.shape, lambda i: (0,) * a.ndim)

    n_weight_elems = in_size * l1 + l1 * l2 + l2 * out_size
    cost = pl.CostEstimate(
        flops=2 * b_p * n_weight_elems,
        transcendentals=b_p * out_size,
        bytes_accessed=(b_p * in_size * 4            # x read (f32, unpadded)
                        + n_weight_elems * 2         # bf16 weights (resident)
                        + (l1 + l2 + out_size) * 4   # f32 biases
                        + b_p * out_size * 4),       # f32 output (lane-compact)
    )

    out_padded = pl.pallas_call(
        cuisine_mlp_kernel,
        out_shape=jax.ShapeDtypeStruct((b_p, out_size), jnp.float32),
        grid=(n_steps,),
        in_specs=[
            pl.BlockSpec((tb, in_size), lambda i: (i, 0)),   # x: tiled over batch
            resident(prepped["w1"]), resident(prepped["b1"]),
            resident(prepped["w2"]), resident(prepped["b2"]),
            resident(prepped["w3"]), resident(prepped["b3"]),
        ],
        out_specs=pl.BlockSpec((tb, out_size), lambda i: (i, 0)),
        compiler_params=pltpu.CompilerParams(
            dimension_semantics=("parallel",)),  # megacore-shardable on v7x
        cost_estimate=cost,
    )(x_in, prepped["w1"], prepped["b1"], prepped["w2"], prepped["b2"],
      prepped["w3"], prepped["b3"])

    return out_padded if b_p == B else out_padded[:B]


def init_params(key, in_size, l1size, l2size, out_size):
    """nn.Linear-style U(-1/sqrt(fan_in), 1/sqrt(fan_in)) init.
    Weights stored transposed: (in_features, out_features)."""
    ks = jax.random.split(key, 6)

    def lin(kw, kb, fan_in, fan_out):
        bound = 1.0 / jnp.sqrt(fan_in)
        w = jax.random.uniform(kw, (fan_in, fan_out), jnp.float32, -bound, bound)
        b = jax.random.uniform(kb, (1, fan_out), jnp.float32, -bound, bound)
        return w, b

    w1, b1 = lin(ks[0], ks[1], in_size, l1size)
    w2, b2 = lin(ks[2], ks[3], l1size, l2size)
    w3, b3 = lin(ks[4], ks[5], l2size, out_size)
    return {"w1": w1, "b1": b1, "w2": w2, "b2": b2, "w3": w3, "b3": b3}


def reference_forward(x, p):
    """Pure-JAX reference applying the same bf16-matmul / f32-accumulate math."""
    bf = jnp.bfloat16
    h1 = jnp.maximum(jnp.dot(x.astype(bf), p["w1"].astype(bf),
                             preferred_element_type=jnp.float32) + p["b1"], 0.0)
    h2 = jnp.maximum(jnp.dot(h1.astype(bf), p["w2"].astype(bf),
                             preferred_element_type=jnp.float32) + p["b2"], 0.0)
    logits = jnp.dot(h2.astype(bf), p["w3"].astype(bf),
                     preferred_element_type=jnp.float32) + p["b3"]
    return jax.nn.softmax(logits, axis=1)


if __name__ == "__main__":
    # Small shapes consistent with the module: batch=8, in=32, l1=64, l2=32, out=16.
    B, IN, L1, L2, OUT = 8, 32, 64, 32, 16

    key = jax.random.PRNGKey(0)
    kx, kp = jax.random.split(key)
    x = jax.random.normal(kx, (B, IN), jnp.float32)
    params = init_params(kp, IN, L1, L2, OUT)

    prepped = prepare_params(params)          # cast weights once
    out = cuisine_nn_forward(x, prepped)
    out = jax.block_until_ready(out)

    ref = reference_forward(x, params)
    assert out.shape == (B, OUT)
    assert jnp.allclose(out, ref, atol=2e-3, rtol=2e-3)
    assert jnp.allclose(jnp.sum(out, axis=1), jnp.ones((B,)), atol=2e-3)

    # Second check: an awkward batch size that exercises the multi-step grid
    # and the minimal row-padding / row-slice path.
    B2 = 100
    x2 = jax.random.normal(jax.random.PRNGKey(1), (B2, IN), jnp.float32)
    out2 = jax.block_until_ready(cuisine_nn_forward(x2, prepped))
    ref2 = reference_forward(x2, params)
    assert out2.shape == (B2, OUT)
    assert jnp.allclose(out2, ref2, atol=2e-3, rtol=2e-3)
    assert jnp.allclose(jnp.sum(out2, axis=1), jnp.ones((B2,)), atol=2e-3)

    print("KERNEL_OK")
</pallas_src>

<mosaic_0001>
module attributes {stable_mosaic.version = 11 : i64} {
  func.func @cuisine_mlp_kernel(%arg0: i32, %arg1: memref<8x32xf32, #tpu.memory_space<vmem>>, %arg2: memref<32x64xbf16, #tpu.memory_space<vmem>>, %arg3: memref<1x64xf32, #tpu.memory_space<vmem>>, %arg4: memref<64x32xbf16, #tpu.memory_space<vmem>>, %arg5: memref<1x32xf32, #tpu.memory_space<vmem>>, %arg6: memref<32x16xbf16, #tpu.memory_space<vmem>>, %arg7: memref<1x16xf32, #tpu.memory_space<vmem>>, %arg8: memref<8x16xf32, #tpu.memory_space<vmem>>) attributes {dimension_semantics = [#tpu.dimension_semantics<parallel>], iteration_bounds = array<i64: 1>, scalar_prefetch = 0 : i64, scratch_operands = 0 : i64, tpu.core_type = #tpu.core_type<tc>, window_params = [{transform_indices = @transform_0, window_bounds = array<i64: 8, 32>}, {pipeline_mode = #tpu.pipeline_mode<synchronous>, transform_indices = @transform_1, window_bounds = array<i64: 32, 64>}, {pipeline_mode = #tpu.pipeline_mode<synchronous>, transform_indices = @transform_2, window_bounds = array<i64: 1, 64>}, {pipeline_mode = #tpu.pipeline_mode<synchronous>, transform_indices = @transform_3, window_bounds = array<i64: 64, 32>}, {pipeline_mode = #tpu.pipeline_mode<synchronous>, transform_indices = @transform_4, window_bounds = array<i64: 1, 32>}, {pipeline_mode = #tpu.pipeline_mode<synchronous>, transform_indices = @transform_5, window_bounds = array<i64: 32, 16>}, {pipeline_mode = #tpu.pipeline_mode<synchronous>, transform_indices = @transform_6, window_bounds = array<i64: 1, 16>}, {transform_indices = @transform_7, window_bounds = array<i64: 8, 16>}]} {
    %c0 = arith.constant 0 : index
    %c0_0 = arith.constant 0 : index
    %0 = vector.load %arg1[%c0, %c0_0] : memref<8x32xf32, #tpu.memory_space<vmem>>, vector<8x32xf32>
    %1 = arith.truncf %0 : vector<8x32xf32> to vector<8x32xbf16>
    %c0_1 = arith.constant 0 : index
    %c0_2 = arith.constant 0 : index
    %2 = vector.load %arg2[%c0_1, %c0_2] : memref<32x64xbf16, #tpu.memory_space<vmem>>, vector<32x64xbf16>
    %cst = arith.constant dense<0.000000e+00> : vector<8x64xf32>
    %3 = tpu.matmul %1, %2, %cst {dimension_numbers = #tpu.dot_dimension_numbers<[1], [0], [0], [1], [0, 0, 1, 1], [], []>} : vector<8x32xbf16>, vector<32x64xbf16>, vector<8x64xf32> -> vector<8x64xf32>
    %c0_3 = arith.constant 0 : index
    %c0_4 = arith.constant 0 : index
    %4 = vector.load %arg3[%c0_3, %c0_4] : memref<1x64xf32, #tpu.memory_space<vmem>>, vector<1x64xf32>
    %5 = vector.broadcast %4 : vector<1x64xf32> to vector<8x64xf32>
    %6 = arith.addf %3, %5 : vector<8x64xf32>
    %cst_5 = arith.constant 0.000000e+00 : f32
    %7 = vector.broadcast %cst_5 : f32 to vector<8x64xf32>
    %8 = arith.maximumf %6, %7 : vector<8x64xf32>
    %9 = arith.truncf %8 : vector<8x64xf32> to vector<8x64xbf16>
    %c0_6 = arith.constant 0 : index
    %c0_7 = arith.constant 0 : index
    %10 = vector.load %arg4[%c0_6, %c0_7] : memref<64x32xbf16, #tpu.memory_space<vmem>>, vector<64x32xbf16>
    %cst_8 = arith.constant dense<0.000000e+00> : vector<8x32xf32>
    %11 = tpu.matmul %9, %10, %cst_8 {dimension_numbers = #tpu.dot_dimension_numbers<[1], [0], [0], [1], [0, 0, 1, 1], [], []>} : vector<8x64xbf16>, vector<64x32xbf16>, vector<8x32xf32> -> vector<8x32xf32>
    %c0_9 = arith.constant 0 : index
    %c0_10 = arith.constant 0 : index
    %12 = vector.load %arg5[%c0_9, %c0_10] : memref<1x32xf32, #tpu.memory_space<vmem>>, vector<1x32xf32>
    %13 = vector.broadcast %12 : vector<1x32xf32> to vector<8x32xf32>
    %14 = arith.addf %11, %13 : vector<8x32xf32>
    %cst_11 = arith.constant 0.000000e+00 : f32
    %15 = vector.broadcast %cst_11 : f32 to vector<8x32xf32>
    %16 = arith.maximumf %14, %15 : vector<8x32xf32>
    %17 = arith.truncf %16 : vector<8x32xf32> to vector<8x32xbf16>
    %c0_12 = arith.constant 0 : index
    %c0_13 = arith.constant 0 : index
    %18 = vector.load %arg6[%c0_12, %c0_13] : memref<32x16xbf16, #tpu.memory_space<vmem>>, vector<32x16xbf16>
    %cst_14 = arith.constant dense<0.000000e+00> : vector<8x16xf32>
    %19 = tpu.matmul %17, %18, %cst_14 {dimension_numbers = #tpu.dot_dimension_numbers<[1], [0], [0], [1], [0, 0, 1, 1], [], []>} : vector<8x32xbf16>, vector<32x16xbf16>, vector<8x16xf32> -> vector<8x16xf32>
    %c0_15 = arith.constant 0 : index
    %c0_16 = arith.constant 0 : index
    %20 = vector.load %arg7[%c0_15, %c0_16] : memref<1x16xf32, #tpu.memory_space<vmem>>, vector<1x16xf32>
    %21 = vector.broadcast %20 : vector<1x16xf32> to vector<8x16xf32>
    %22 = arith.addf %19, %21 : vector<8x16xf32>
    %cst_17 = arith.constant dense<0xFF800000> : vector<8xf32>
    %23 = vector.multi_reduction <maximumf>, %22, %cst_17 [1] : vector<8x16xf32> to vector<8xf32>
    %24 = vector.shape_cast %23 : vector<8xf32> to vector<8x1xf32>
    %25 = vector.broadcast %24 : vector<8x1xf32> to vector<8x16xf32>
    %26 = arith.subf %22, %25 : vector<8x16xf32>
    %27 = math.exp %26 : vector<8x16xf32>
    %cst_18 = arith.constant dense<0.000000e+00> : vector<8xf32>
    %28 = vector.multi_reduction <add>, %27, %cst_18 [1] : vector<8x16xf32> to vector<8xf32>
    %29 = vector.shape_cast %28 : vector<8xf32> to vector<8x1xf32>
    %30 = vector.broadcast %29 : vector<8x1xf32> to vector<8x16xf32>
    %31 = arith.divf %27, %30 : vector<8x16xf32>
    %c0_19 = arith.constant 0 : index
    %c0_20 = arith.constant 0 : index
    %32 = vector.load %arg8[%c0_19, %c0_20] : memref<8x16xf32, #tpu.memory_space<vmem>>, vector<8x16xf32>
    tpu.vector_store %arg8[%c0_19, %c0_20], %31 {strides = array<i32>} : memref<8x16xf32, #tpu.memory_space<vmem>>, vector<8x16xf32>,
    return
  }
  func.func @transform_0(%arg0: i32) -> (i32, i32) {
    %c0_i32 = arith.constant 0 : i32
    %c0_i32_0 = arith.constant 0 : i32
    return %arg0, %c0_i32 : i32, i32
  }
  func.func @transform_1(%arg0: i32) -> (i32, i32) {
    %c0_i32 = arith.constant 0 : i32
    %c0_i32_0 = arith.constant 0 : i32
    %c0_i32_1 = arith.constant 0 : i32
    return %c0_i32, %c0_i32_0 : i32, i32
  }
  func.func @transform_2(%arg0: i32) -> (i32, i32) {
    %c0_i32 = arith.constant 0 : i32
    %c0_i32_0 = arith.constant 0 : i32
    %c0_i32_1 = arith.constant 0 : i32
    return %c0_i32, %c0_i32_0 : i32, i32
  }
  func.func @transform_3(%arg0: i32) -> (i32, i32) {
    %c0_i32 = arith.constant 0 : i32
    %c0_i32_0 = arith.constant 0 : i32
    %c0_i32_1 = arith.constant 0 : i32
    return %c0_i32, %c0_i32_0 : i32, i32
  }
  func.func @transform_4(%arg0: i32) -> (i32, i32) {
    %c0_i32 = arith.constant 0 : i32
    %c0_i32_0 = arith.constant 0 : i32
    %c0_i32_1 = arith.constant 0 : i32
    return %c0_i32, %c0_i32_0 : i32, i32
  }
  func.func @transform_5(%arg0: i32) -> (i32, i32) {
    %c0_i32 = arith.constant 0 : i32
    %c0_i32_0 = arith.constant 0 : i32
    %c0_i32_1 = arith.constant 0 : i32
    return %c0_i32, %c0_i32_0 : i32, i32
  }
  func.func @transform_6(%arg0: i32) -> (i32, i32) {
    %c0_i32 = arith.constant 0 : i32
    %c0_i32_0 = arith.constant 0 : i32
    %c0_i32_1 = arith.constant 0 : i32
    return %c0_i32, %c0_i32_0 : i32, i32
  }
  func.func @transform_7(%arg0: i32) -> (i32, i32) {
    %c0_i32 = arith.constant 0 : i32
    %c0_i32_0 = arith.constant 0 : i32
    return %arg0, %c0_i32 : i32, i32
  }
}

</mosaic_0001>

<bundles_post_ra>
// kernel: tpu_custom_call.1
= control target key start
LH: loop header
LB: loop body
LE: loop exit
PB: predicated region body
PF: predicated region fallthrough
CT: control target
= control target key end

     0   :  { %s364_s0 = inlined_call_operand.vmem [shape: f32[8,32], index: 0, kind: input, shape index: {}]   ;;  %s365_s1 = inlined_call_operand.vmem [shape: bf16[32,64], index: 1, kind: input, shape index: {}]   ;;  %s366_s2 = inlined_call_operand.vmem [shape: f32[1,64], index: 2, kind: input, shape index: {}]   ;;  %s367_s3 = inlined_call_operand.vmem [shape: bf16[64,32], index: 3, kind: input, shape index: {}]   ;;  %s368_s4 = inlined_call_operand.vmem [shape: f32[1,32], index: 4, kind: input, shape index: {}]   ;;  %s369_s5 = inlined_call_operand.vmem [shape: bf16[32,16], index: 5, kind: input, shape index: {}]   ;;  %s370_s6 = inlined_call_operand.vmem [shape: f32[1,16], index: 6, kind: input, shape index: {}]   ;;  %s371_s7 = inlined_call_operand.hbm [shape: f32[8,16], index: 7, kind: output, shape index: {}]  }
   0x1   :  { %v238_v0 = vld [vmem:[%s365_s1 + $0x8] sm:$0xff]  ;;  %v237_v1 = vld [vmem:[%s365_s1] sm:$0xff]  ;;  %v242_v2 = vld [vmem:[%s367_s3 + $0x18] sm:$0xff] }
   0x2   :  { %60 = vmatpush.bf16.msra.mxu0 %v238_v0  ;;  %v28_v3 = vld [vmem:[%s364_s0] sm:$0xff]  ;;  %113 = vmatpush.bf16.msra.mxu1 %v242_v2  ;;  %v241_v4 = vld [vmem:[%s367_s3 + $0x10] sm:$0xff] }
   0x3   :  { %12 = vsyncpa [#allocation3], 0  ;;  %v29_v5 = vpack.c.bf16 %v28_v3, %v28_v3  ;;  %vm50_vm0 = vcmask 261120   ;;  %v240_v6 = vld [vmem:[%s367_s3 + $0x8] sm:$0xff]  ;;  %v239_v7 = vld [vmem:[%s367_s3] sm:$0xff]  ;;  %vm105_vm1 = vcmask 523264  }
   0x4   :  { %v246_v8 = vld [vmem:[%s366_s2] ss:$0 sm:$0xff]  ;;  %v244_v14 = vld [vmem:[%s369_s5 + $0x8] sm:$0xff]  ;;  %vm160_vm2 = vcmask 130048   ;;  %s193_s22 = sshll.u32 %s371_s7, 4  ;;  %s194_s22 = int_to_ptr.hbm [resolvable:$true] %s193_s22 }
   0x5   :  { %153 = vmatpush.bf16.msra.mxu2 %v244_v14  ;;  %v243_v15 = vld [vmem:[%s369_s5] sm:$0xff] }
   0x6   :  { %61 = vmatpush.bf16.msra.mxu0 %v237_v1  ;;  %114 = vmatpush.bf16.msra.mxu1 %v241_v4  ;;  %v247_v16 = vld [vmem:[%s368_s4] ss:$0 sm:$0xff]  ;;  %s279_s4 = smov [#allocation2]  }
   0x7   :  { %v248_v22 = vld [vmem:[%s370_s6] ss:$0 sm:$0xff]  ;;  %s191_s5 = sshll.u32 %s279_s4, 4  ;;  %s192_s5 = int_to_ptr.vmem [resolvable:$true] %s191_s5 }
   0x9   :  { %210 = vmatmul.msk.bf16.vlgmr.msra.gmra.mxu0 %vm50_vm0, %v29_v5  ;;  %154 = vmatpush.bf16.msra.mxu2 %v243_v15 }
   0xa   :  { %115 = vmatpush.bf16.msra.mxu1 %v240_v6 }
   0xe   :  { %116 = vmatpush.bf16.msra.mxu1 %v239_v7 }
  0x86   :  { %v63_v9 = vpop.f32.mrf.mxu0 }
  0x87   :  { %v64_v10 = vadd.f32 %v246_v8, %v63_v9 }
  0x89   :  { %v67_v11 = vmax.f32 %v64_v10, 0.0 }
  0x8b   :  { %v68_v12 = vpack.c.bf16 %v67_v11, %v67_v11 }
  0x8d   :  { %227 = vmatmul.msk.bf16.vlgmr.msra.gmra.mxu1 %vm105_vm1, %v68_v12 }
  0x8e   :  { %v65_v13 = vpop.f32.mrf.mxu0 }
 0x10a   :  { %v118_v17 = vpop.f32.mrf.mxu1 }
 0x10b   :  { %v119_v18 = vadd.f32 %v247_v16, %v118_v17 }
 0x10d   :  { %v122_v19 = vmax.f32 %v119_v18, 0.0 }
 0x10f   :  { %v123_v20 = vpack.c.bf16 %v122_v19, %v122_v19 }
 0x111   :  { %236 = vmatmul.msk.bf16.vlgmr.msra.gmra.mxu2 %vm50_vm0, %v123_v20 }
 0x112   :  { %v120_v21 = vpop.f32.mrf.mxu1 }
 0x194   :  { %v156_v23 = vpop.f32.mrf.mxu2 }
 0x195   :  { %v157_v24 = vadd.f32 %v248_v22, %v156_v23 }
 0x197   :  { %v161_v25 = vsel %vm160_vm2, %v157_v24, -inf }
 0x198   :  { %162 = vmax.xlane.f32.xlu0 %v161_v25 }
 0x19c   :  { %v158_v26 = vpop.f32.mrf.mxu2 }
 0x20b   :  { %v163_v27 = vpop.xlane.xlu0 %162 }
 0x20c   :  { %v164_v28 = vsub.f32 %v157_v24, %v163_v27 }
 0x20e   :  { %v165_v29 = vmul.f32 1.442695, %v164_v28 }
 0x210   :  { %249 = vpow2.f32 %v165_v29 }
 0x216   :  { %v250_v30 = vpop.eup %249 }
 0x217   :  { %v167_v31 = vsel %vm160_vm2, %v250_v30, 0.0 }
 0x218   :  { %168 = vadd.xlane.f32.xlu0 %v167_v31 }
 0x28b   :  { %v169_v32 = vpop.xlane.xlu0 %168 }
 0x28c   :  { %251 = vrcp.f32 %v169_v32  ;;  %v181_v36 = vand.u32 2147483648, %v169_v32  ;;  %v179_v38 = vand.u32 2147483647, %v169_v32  ;;  %vm175_vm4 = vweird.f32 %v169_v32 }
 0x28e   :  { %v182_v40 = vor.u32 1.1754944e-38, %v181_v36  ;;  %vm180_vm6 = vcmp.eq.f32.partialorder %v179_v38, 8.507059e+37 }
 0x292   :  { %v252_v33 = vpop.eup %251 }
 0x293   :  { %v171_v34 = vmul.f32 %v252_v33, %v169_v32  ;;  %vm176_vm3 = vweird.f32 %v252_v33 }
 0x294   :  { %vm177_vm5 = vmor %vm175_vm4, %vm176_vm3 }
 0x295   :  { %v172_v35 = vsub.f32 1.0, %v171_v34 }
 0x297   :  { %v173_v37 = vmul.f32 %v252_v33, %v172_v35 }
 0x299   :  { %v174_v39 = vadd.f32 %v252_v33, %v173_v37 }
 0x29b   :  { %v178_v41 = vsel %vm177_vm5, %v252_v33, %v174_v39 }
 0x29c   :  { %v183_v42 = vsel %vm180_vm6, %v182_v40, %v178_v41 }
 0x29d   :  { %v184_v43 = vmul.f32 %v250_v30, %v183_v42 }
 0x29f   :  { %185 = vst.msk [vmem:[#allocation2] sm:$0xff] %vm160_vm2, %v184_v43 }
 0x2a0   :  { %196 = dma.vmem_to_hbm [thread:$0]  %s192_s5, 128, %s194_s22, [#allocation3]  }
 0x2a1   :  { %277 = dma.done.wait [#allocation3], 128  }
 0x2a2   :  { %278 = vsyncadd [#allocation3], 4294967168 }
 0x2a3   :  { %201 = vsyncpa [#allocation3], 1 }

</bundles_post_ra>
